<compile_context>
chip_gen: v6e
topology: v6e:2x2x1
jax: 0.10.0
libtpu: 0.0.40
codegen_flags: <defaults>
</compile_context>

<pallas_src>
import jax
import jax.numpy as jnp
import numpy as np
from jax import lax
from jax.experimental import pallas as pl
from jax.experimental.pallas import tpu as pltpu


def _cdiv(a, b):
    return -(-a // b)


def _round_up(v, m):
    return (v + m - 1) // m * m


def _conv_taps(ksize, stride, dilation):
    """Per-tap (phase, lane offset) of the phase-split input."""
    taps = [((k * dilation) % stride, (k * dilation) // stride)
            for k in range(ksize)]
    q_max = max(q for _, q in taps)
    return taps, q_max


def _pad_and_phase_split(x_ncl, stride, padding, lq):
    """(B, C, L) -> (B, stride*C, lq) with x_flat[b, r*C+c, i] = x_pad[b, c, i*stride+r]."""
    b, c_in, l = x_ncl.shape
    pad_right = lq * stride - l - padding
    x_pad = jnp.pad(x_ncl, ((0, 0), (0, 0), (padding, pad_right)))
    if stride == 1:
        return x_pad
    xs = jnp.transpose(x_pad.reshape(b, c_in, lq, stride), (0, 3, 1, 2))
    return xs.reshape(b, stride * c_in, lq)


def _plan_tiles(b, rows, c_in, c_out, l_out, q_max, ksize, in_isz, out_isz,
                budget=36 << 20):
    """Pick (tl, b_tile) so the per-step VMEM footprint stays under `budget`
    (kept well below v7x's 64 MiB per-TC VMEM).  Estimates are dtype-aware
    (bf16 packs 16 sublanes, int8 packs 32)."""
    sub_in = 8 * max(1, 4 // in_isz)
    sub_out = 8 * max(1, 4 // out_isz)

    def vmem_need(b_tile, tl):
        w_lanes = _round_up(tl + q_max, 128)
        xbuf = b_tile * _round_up(rows, sub_in) * w_lanes * in_isz      # scratch
        oblk = 2 * b_tile * _round_up(c_out, sub_out) * tl * out_isz    # dbl-buffered
        wblk = 2 * ksize * _round_up(c_out, sub_in) * _round_up(c_in, 128) * in_isz
        bblk = 2 * _round_up(c_out, 8) * 128 * 4
        return xbuf + oblk + wblk + bblk

    bt_cands = [d for d in range(min(b, 8), 0, -1) if b % d == 0]
    b_tile = bt_cands[0]
    tl = max(128, min(4096, _round_up(l_out, 128)))
    while vmem_need(b_tile, tl) > budget and tl > 128:
        tl = max(128, (tl // 256) * 128)        # halve, stay a multiple of 128
    bi = 0
    while vmem_need(b_tile, tl) > budget and bi + 1 < len(bt_cands):
        bi += 1
        b_tile = bt_cands[bi]
    # Distribute l_out evenly over the L tiles (avoids a nearly-empty ragged
    # last tile and the extra right padding it would force).
    n_lt = _cdiv(l_out, tl)
    tl = max(128, _round_up(_cdiv(l_out, n_lt), 128))
    n_lt = _cdiv(l_out, tl)
    w_lanes = _round_up(tl + q_max, 128)
    return tl, b_tile, n_lt, w_lanes, vmem_need(b_tile, tl)


# --------------------------- kernels -----------------------------------------
def _make_tiled_kernel(taps, b_tile, c_in, c_out, tl, w_lanes, preload):
    """General path: one (batch block, L tile) per grid step; x is fetched by a
    halo'd manual DMA, K taps are matmul-accumulated on the MXU."""

    def kernel(x_hbm, w_ref, b_ref, o_ref, xbuf, sem):
        ib = pl.program_id(0)
        jt = pl.program_id(1)
        # ---- halo'd input window HBM -> VMEM (overlaps its neighbour by
        #      q_max lanes, so x VMEM stays O(tile) instead of O(L)).
        src = pl.multiple_of(jt * tl, 128)
        cp = pltpu.make_async_copy(
            x_hbm.at[pl.ds(ib * b_tile, b_tile), :, pl.ds(src, w_lanes)],
            xbuf, sem)
        cp.start()
        cp.wait()

        # Per-tap weights hoisted out of the batch loop (tiny loads).
        w_taps = [w_ref[t] for t in range(len(taps))]       # (C_out, C_in) each
        bias_tile = jnp.broadcast_to(b_ref[...], (c_out, tl))  # f32, hoisted

        for bi in range(b_tile):                             # static unroll (<= 8)
            acc = bias_tile                                  # bias = accumulator init
            x_blk = xbuf[bi] if preload else None            # one aligned load
            for t, (r, q) in enumerate(taps):                # static unroll over taps
                if preload:
                    # register-level lane shift of the already-loaded block
                    win = x_blk[r * c_in:(r + 1) * c_in, q:q + tl]
                else:
                    win = xbuf[bi, r * c_in:(r + 1) * c_in, q:q + tl]
                acc = acc + jnp.dot(w_taps[t], win,
                                    preferred_element_type=jnp.float32)
            # lane-dense store: tl is a multiple of 128
            o_ref[bi] = acc.astype(o_ref.dtype)

    return kernel


def _make_small_kernel(taps, b, c_in, c_out, lp):
    """Tiny-L path: whole problem in one step; batch folded into lanes so the
    output slab (C_out, B*lp) gets full-width unmasked stores."""

    def kernel(x_ref, w_ref, b_ref, o_ref):
        w_taps = [w_ref[t] for t in range(len(taps))]
        bias_tile = jnp.broadcast_to(b_ref[...], (c_out, lp))
        for bi in range(b):
            acc = bias_tile
            x_blk = x_ref[bi]                                # (rows, lq), tiny
            for t, (r, q) in enumerate(taps):
                acc = acc + jnp.dot(w_taps[t],
                                    x_blk[r * c_in:(r + 1) * c_in, q:q + lp],
                                    preferred_element_type=jnp.float32)
            o_ref[:, bi * lp:(bi + 1) * lp] = acc.astype(o_ref.dtype)

    return kernel


# --------------------------- wrapper ------------------------------------------
def conv_norm_forward(x_ncl, weight_oik, bias=None, *, stride=1, dilation=1,
                      padding=None, compute_dtype=None):
    """Forward of ConvNorm.

    x_ncl:      (B, C_in, L)        -- PyTorch NCL layout
    weight_oik: (C_out, C_in, K)    -- PyTorch Conv1d weight layout
    bias:       (C_out,) or None
    compute_dtype: optional dtype for x/w inside the kernel (bf16 recommended
                   on all generations -- it halves input DMA bytes);
                   accumulation is always f32, output keeps x's dtype.
    returns:    (B, C_out, L_out)   -- PyTorch NCL layout
    """
    c_out, c_in, ksize = weight_oik.shape
    if padding is None:
        assert ksize % 2 == 1
        padding = int(dilation * (ksize - 1) / 2)
    b, _, l = x_ncl.shape
    l_out = (l + 2 * padding - dilation * (ksize - 1) - 1) // stride + 1
    assert l_out >= 1

    taps, q_max = _conv_taps(ksize, stride, dilation)
    rows = stride * c_in
    out_dtype = x_ncl.dtype
    cdt = np.dtype(compute_dtype) if compute_dtype is not None else np.dtype(x_ncl.dtype)
    in_isz = cdt.itemsize
    out_isz = np.dtype(out_dtype).itemsize

    w_koc = jnp.transpose(weight_oik, (2, 0, 1)).astype(cdt)   # (K, C_out, C_in)
    if bias is None:
        bias = jnp.zeros((c_out,), jnp.float32)
    b_2d = bias.reshape(c_out, 1).astype(jnp.float32)           # bias stays f32

    # ---------------- tiny-L path: lane-dense folded output --------------------
    lp = _round_up(l_out, 128)
    if (l_out <= 128 and b * lp <= 8192
            and b * rows * (lp + q_max) * in_isz <= (4 << 20)
            and b * c_out * lp * 4 <= (4 << 20)):
        lq = max(lp + q_max, _cdiv(l + padding, stride))
        xs = _pad_and_phase_split(x_ncl, stride, padding, lq).astype(cdt)
        out_flat = pl.pallas_call(
            _make_small_kernel(taps, b, c_in, c_out, lp),
            out_shape=jax.ShapeDtypeStruct((c_out, b * lp), out_dtype),
        )(xs, w_koc, b_2d)
        out = jnp.transpose(out_flat.reshape(c_out, b, lp), (1, 0, 2))
        return out[:, :, :l_out]

    # ---------------- general path: L-tiled, halo'd manual DMA -----------------
    tl, b_tile, n_lt, w_lanes, need = _plan_tiles(
        b, rows, c_in, c_out, l_out, q_max, ksize, in_isz, out_isz)
    n_bt = b // b_tile
    lq = max((n_lt - 1) * tl + w_lanes, _cdiv(l + padding, stride))
    # TODO(synk): this jnp.pad / phase-split is the remaining full-array
    # pre-pass over x (see header TODO).
    xs = _pad_and_phase_split(x_ncl, stride, padding, lq).astype(cdt)

    # Load the halo'd block as a value once per (batch, step) when it is small
    # enough to live in registers; the K tap windows are then register shifts.
    preload = rows * w_lanes * in_isz <= 64 * 1024
    # Planner targets <= 36 MiB, so this normally stays <= 44 MiB (safe under
    # v7x's 64 MiB per-TC VMEM); pathological channel counts may only fit the
    # larger v5e/v6e VMEM.
    vmem_limit = int(min(max(need + (8 << 20), 32 << 20), 100 << 20))

    out = pl.pallas_call(
        _make_tiled_kernel(taps, b_tile, c_in, c_out, tl, w_lanes, preload),
        out_shape=jax.ShapeDtypeStruct((b, c_out, l_out), out_dtype),
        grid=(n_bt, n_lt),
        in_specs=[
            # x stays in HBM; the kernel DMAs a halo'd (b_tile, rows, w_lanes)
            # window per grid step.
            pl.BlockSpec(memory_space=pl.ANY),
            # weight / bias: whole (tiny) arrays, constant across the grid.
            pl.BlockSpec((ksize, c_out, c_in), lambda ib, jt: (0, 0, 0)),
            pl.BlockSpec((c_out, 1), lambda ib, jt: (0, 0)),
        ],
        out_specs=pl.BlockSpec((b_tile, c_out, tl), lambda ib, jt: (ib, 0, jt)),
        scratch_shapes=[
            pltpu.VMEM((b_tile, rows, w_lanes), cdt),
            pltpu.SemaphoreType.DMA,
        ],
        # x is L-tiled with halos, so splitting either axis across v7x's two
        # TensorCores no longer duplicates the x read stream.
        compiler_params=pltpu.CompilerParams(
            dimension_semantics=("parallel", "parallel"),
            vmem_limit_bytes=vmem_limit),
    )(xs, w_koc, b_2d)
    return out                                              # (B, C_out, L_out)


# ----------------------------- self-test --------------------------------------
def _conv1d_reference(x, w, bias, stride, dilation, padding):
    out = lax.conv_general_dilated(
        x, w, window_strides=(stride,), padding=[(padding, padding)],
        rhs_dilation=(dilation,), dimension_numbers=("NCH", "OIH", "NCH"))
    return out + bias[None, :, None]


def _run_case(name, b, c_in, c_out, l, ksize, stride=1, dilation=1,
              compute_dtype=None, round_to_bf16=False, rtol=1e-4, atol=1e-4):
    key = jax.random.PRNGKey(0)
    kx, kw, kb = jax.random.split(key, 3)
    x = jax.random.normal(kx, (b, c_in, l), dtype=jnp.float32)
    fan_in = c_in * ksize
    bound = 1.0 / np.sqrt(fan_in)
    weight = jax.random.uniform(kw, (c_out, c_in, ksize), jnp.float32, -bound, bound)
    bias = jax.random.uniform(kb, (c_out,), jnp.float32, -bound, bound)
    if round_to_bf16:   # pre-round so bf16 compute vs f32 reference is ~exact
        x = x.astype(jnp.bfloat16).astype(jnp.float32)
        weight = weight.astype(jnp.bfloat16).astype(jnp.float32)

    out = conv_norm_forward(x, weight, bias, stride=stride, dilation=dilation,
                            compute_dtype=compute_dtype)
    out = jax.block_until_ready(out)

    pad = dilation * (ksize - 1) // 2
    ref = _conv1d_reference(x, weight, bias, stride, dilation, pad)
    assert out.shape == ref.shape, (name, out.shape, ref.shape)
    np.testing.assert_allclose(np.asarray(out), np.asarray(ref),
                               rtol=rtol, atol=atol, err_msg=name)


if __name__ == "__main__":
    # Canonical tiny module configs (ConvNorm(4, 8), L=16) -> lane-dense small path.
    _run_case("f32_k1_default", b=2, c_in=4, c_out=8, l=16, ksize=1)
    _run_case("f32_small_k3", b=2, c_in=4, c_out=8, l=16, ksize=3)
    _run_case("bf16_small", b=2, c_in=4, c_out=8, l=16, ksize=3,
              compute_dtype=jnp.bfloat16, rtol=2e-2, atol=2e-2)
    # General path: L-tiled, halo'd manual DMA, multi-tile + ragged edge.
    _run_case("f32_tiled_dilated", b=2, c_in=4, c_out=8, l=9000, ksize=5, dilation=2)
    _run_case("f32_ragged_tile", b=1, c_in=4, c_out=8, l=4100, ksize=3)
    # Strided path (phase-split input folded into the row dim).
    _run_case("f32_strided", b=3, c_in=6, c_out=8, l=640, ksize=3, stride=2)
    # Wider channels (exercises the non-preloaded window branch).
    _run_case("f32_wide_channels", b=2, c_in=32, c_out=16, l=2000, ksize=3,
              rtol=2e-3, atol=2e-3)
    # bf16 compute on the tiled path, f32 accumulation.
    _run_case("bf16_tiled", b=2, c_in=4, c_out=8, l=5000, ksize=3,
              compute_dtype=jnp.bfloat16, round_to_bf16=True, rtol=1e-3, atol=1e-3)
    print("KERNEL_OK")
</pallas_src>

<mosaic_0001>
module attributes {stable_mosaic.version = 11 : i64} {
  func.func @kernel(%arg0: memref<2x4x128xf32, #tpu.memory_space<vmem>>, %arg1: memref<1x8x4xf32, #tpu.memory_space<vmem>>, %arg2: memref<8x1xf32, #tpu.memory_space<vmem>>, %arg3: memref<8x256xf32, #tpu.memory_space<vmem>>) attributes {dimension_semantics = [], scalar_prefetch = 0 : i64, scratch_operands = 0 : i64, tpu.core_type = #tpu.core_type<tc>} {
    %c0 = arith.constant 0 : index
    %c0_0 = arith.constant 0 : index
    %c0_1 = arith.constant 0 : index
    %0 = vector.load %arg1[%c0, %c0_0, %c0_1] : memref<1x8x4xf32, #tpu.memory_space<vmem>>, vector<1x8x4xf32>
    %1 = vector.shape_cast %0 : vector<1x8x4xf32> to vector<8x4xf32>
    %c0_2 = arith.constant 0 : index
    %c0_3 = arith.constant 0 : index
    %2 = vector.load %arg2[%c0_2, %c0_3] : memref<8x1xf32, #tpu.memory_space<vmem>>, vector<8x1xf32>
    %3 = vector.shape_cast %2 : vector<8x1xf32> to vector<8x1xf32>
    %4 = vector.broadcast %3 : vector<8x1xf32> to vector<8x128xf32>
    %c0_4 = arith.constant 0 : index
    %c0_5 = arith.constant 0 : index
    %c0_6 = arith.constant 0 : index
    %5 = vector.load %arg0[%c0_4, %c0_5, %c0_6] : memref<2x4x128xf32, #tpu.memory_space<vmem>>, vector<1x4x128xf32>
    %6 = vector.shape_cast %5 : vector<1x4x128xf32> to vector<4x128xf32>
    %cst = arith.constant dense<0.000000e+00> : vector<8x128xf32>
    %7 = tpu.matmul %1, %6, %cst {dimension_numbers = #tpu.dot_dimension_numbers<[1], [0], [0], [1], [0, 0, 1, 1], [], []>} : vector<8x4xf32>, vector<4x128xf32>, vector<8x128xf32> -> vector<8x128xf32>
    %8 = arith.addf %4, %7 : vector<8x128xf32>
    %c0_7 = arith.constant 0 : index
    %c0_8 = arith.constant 0 : index
    %9 = vector.load %arg3[%c0_7, %c0_8] : memref<8x256xf32, #tpu.memory_space<vmem>>, vector<8x128xf32>
    tpu.vector_store %arg3[%c0_7, %c0_8], %8 {strides = array<i32>} : memref<8x256xf32, #tpu.memory_space<vmem>>, vector<8x128xf32>,
    %c1 = arith.constant 1 : index
    %c0_9 = arith.constant 0 : index
    %c0_10 = arith.constant 0 : index
    %10 = vector.load %arg0[%c1, %c0_9, %c0_10] : memref<2x4x128xf32, #tpu.memory_space<vmem>>, vector<1x4x128xf32>
    %11 = vector.shape_cast %10 : vector<1x4x128xf32> to vector<4x128xf32>
    %cst_11 = arith.constant dense<0.000000e+00> : vector<8x128xf32>
    %12 = tpu.matmul %1, %11, %cst_11 {dimension_numbers = #tpu.dot_dimension_numbers<[1], [0], [0], [1], [0, 0, 1, 1], [], []>} : vector<8x4xf32>, vector<4x128xf32>, vector<8x128xf32> -> vector<8x128xf32>
    %13 = arith.addf %4, %12 : vector<8x128xf32>
    %c0_12 = arith.constant 0 : index
    %c128 = arith.constant 128 : index
    %14 = vector.load %arg3[%c0_12, %c128] : memref<8x256xf32, #tpu.memory_space<vmem>>, vector<8x128xf32>
    tpu.vector_store %arg3[%c0_12, %c128], %13 {strides = array<i32>} : memref<8x256xf32, #tpu.memory_space<vmem>>, vector<8x128xf32>,
    return
  }
}

</mosaic_0001>

<bundles_post_ra>
// kernel: tpu_custom_call.1
= control target key start
LH: loop header
LB: loop body
LE: loop exit
PB: predicated region body
PF: predicated region fallthrough
CT: control target
= control target key end

     0   :  { %vm27_vm0 = vcmask 1043456   ;;  %v240_v1 = vmov 0.0   ;;  %vm23_vm1 = vcmask 31744   ;;  %vm241_vm2 = vmmov 0   ;;  %s279_s0 = inlined_call_operand.vmem [shape: f32[2,4,128], index: 0, kind: input, shape index: {}]   ;;  %s280_s1 = inlined_call_operand.vmem [shape: f32[1,8,4], index: 1, kind: input, shape index: {}]   ;;  %s281_s2 = inlined_call_operand.vmem [shape: f32[8,1], index: 2, kind: input, shape index: {}]   ;;  %s282_s3 = inlined_call_operand.hbm [shape: f32[8,256], index: 3, kind: output, shape index: {}]  }
   0x1   :  { %v22_v0 = vld [vmem:[%s279_s0] sm:$0xf]  ;;  %203 = vmatprep.subr.mxu0 %v240_v1  ;;  %208 = vmatprep.subr.mxu1 %v240_v1  ;;  %v196_v2 = vld [vmem:[%s279_s0 + $0x4] sm:$0xf] }
   0x2   :  { %v15_v3 = vld [vmem:[%s280_s1] sm:$0xff]  ;;  %204 = vmatpush3.msk.msra.mxu0 %vm27_vm0, %v22_v0  ;;  %205 = vmatprep.mubr.msk.f32.mxu0 %vm241_vm2, %v240_v1 }
   0x3   :  { %8 = vsyncpa [#allocation3], 0  ;;  %209 = vmatpush3.msk.msra.mxu1 %vm27_vm0, %v196_v2  ;;  %210 = vmatprep.mubr.msk.f32.mxu1 %vm241_vm2, %v240_v1  ;;  %v16_v4 = vld [vmem:[%s281_s2] sm:$0xff]  ;;  %v242_v5 = vmov 0   ;;  %s243_s0 = smov [#allocation2]  }
   0x4   :  { %206 = vmatmul.mubr.msk.f32.vlgmr.msra.gmra.mxu0 %vm23_vm1, %v15_v3  ;;  %211 = vmatmul.mubr.msk.f32.vlgmr.msra.gmra.mxu1 %vm23_vm1, %v15_v3  ;;  %s186_s20 = sshll.u32 %s243_s0, 4  ;;  %s187_s20 = int_to_ptr.vmem [resolvable:$true] %s186_s20 }
   0x5   :  { %217 = vset.pattern.permute.xlu0 %v242_v5  ;;  %s218_s1 = scalar_lea.vmem %s187_s20, 256  ;;  %p223_p1 = scmp.lt.s32.totalorder %s187_s20, %s187_s20 }
   0x6   :  { %19 = vperm.xlu0 %217, %v16_v4   ;;  %p219_p0 = scmp.ne.s32.totalorder %s187_s20, %s218_s1  ;;  %p224_p2 = scmp.lt.s32.totalorder %s218_s1, %s218_s1 }
   0x8   :  { %p225_p3 = por %p224_p2, %p223_p1 }
   0xa   :  { %p226_p4 = pnand %p225_p3, %p219_p0 }
  0x81   :  { %v20_v6 = vpop.permute.xlu0 %19 }
  0xc4   :  { %v97_v7 = vpop.f32.mrf.mxu0  ;;  %v174_v8 = vpop.f32.mrf.mxu1 }
  0xc5   :  { %v101_v9 = vadd.f32 %v97_v7, %v20_v6  ;;  %v178_v10 = vadd.f32 %v174_v8, %v20_v6 }
  0xc6   :  { %v207_v11 = vpop.f32.mrf.mxu0  ;;  %v212_v12 = vpop.f32.mrf.mxu1 }
  0xc7   :  { %102 = vst [vmem:[#allocation2] sm:$0xff] %v101_v9  ;;  %179 = vst [vmem:[#allocation2 + $0x8] sm:$0xff] %v178_v10 }
  0xc8   :  { %229 = shalt.err (!%p226_p4)
}
  0xc9   :  { %189 = dma.vmem_to_hbm [thread:$0]  %s187_s20, 256, %s282_s3, [#allocation3]  }
  0xca   :  { %238 = dma.done.wait [#allocation3], 256  }
  0xcb   :  { %239 = vsyncadd [#allocation3], 4294967040 }
  0xcc   :  { %193 = vsyncpa [#allocation3], 1 }

</bundles_post_ra>
